<compile_context>
chip_gen: v7x
topology: tpu7x:2x2x1
jax: 0.10.0
libtpu: 0.0.40
codegen_flags: <defaults>
</compile_context>

<pallas_src>
import math

import jax
import jax.numpy as jnp
from jax.experimental import pallas as pl
from jax.experimental.pallas import tpu as pltpu

_LANE_WIDTHS = (8192, 4096, 2048, 1024, 512, 256, 128)  # lane-dense candidates
_TARGET_BLOCK_BYTES = 2 * 1024 * 1024  # ~2 MiB per buffer: safe on v5e/v6e/v7x


def _copy_kernel(x_ref, o_ref):
    # Identity copy of one block — the entire "compute" of a materialized
    # reshape is moving bytes while keeping flat order.
    o_ref[...] = x_ref[...]


def _resolve_shape(total, shape):
    """Mirror torch.view's -1 handling."""
    shape = tuple(int(s) for s in shape)
    if -1 in shape:
        idx = shape.index(-1)
        rest = math.prod(s for i, s in enumerate(shape) if i != idx)
        assert rest > 0 and total % rest == 0, "invalid view shape"
        shape = shape[:idx] + (total // rest,) + shape[idx + 1:]
    assert math.prod(shape) == total, "view shape must preserve element count"
    return shape


def reshape_pallas(x, *shape, force_copy=False):
    """Equivalent of Reshape(*shape)(x) for a contiguous input.

    Default: metadata-only reshape (no data movement), matching torch.view.
    force_copy=True: materialize the result through a tiled Pallas copy.
    """
    total = int(x.size)
    out_shape = _resolve_shape(total, shape)

    # Fast path: a contiguous row-major reshape needs no data movement.
    if not force_copy or total == 0:
        return jnp.reshape(x, out_shape)

    itemsize = jnp.dtype(x.dtype).itemsize
    cost = pl.CostEstimate(flops=0, transcendentals=0,
                           bytes_accessed=2 * total * itemsize)

    # Pick the widest lane-dense factorization (R, C) of `total` — no padding,
    # no tail slice, unmasked lane-dense stores.
    C = None
    for c in _LANE_WIDTHS:
        if total % c == 0:
            C = c
            break

    if C is None:
        # Odd size (not a multiple of 128): single whole-array block copy.
        flat = jnp.reshape(x, (total,))
        out = pl.pallas_call(
            _copy_kernel,
            out_shape=jax.ShapeDtypeStruct((total,), x.dtype),
            input_output_aliases={0: 0},
            cost_estimate=cost,
        )(flat)
        return jnp.reshape(out, out_shape)

    R = total // C

    # Dtype-aware minimum sublane multiple (f32: 8, bf16: 16, int8: 32).
    sublane = max(8, 32 // itemsize)
    tr = max(1, _TARGET_BLOCK_BYTES // (C * itemsize))
    tr = max(sublane, (tr // sublane) * sublane)
    if tr >= R:
        tr = R  # full row extent is always a legal block dim

    grid = (pl.cdiv(R, tr),)  # ragged last block (if any) is masked by Pallas

    slab = jnp.reshape(x, (R, C))
    out = pl.pallas_call(
        _copy_kernel,
        out_shape=jax.ShapeDtypeStruct((R, C), x.dtype),
        grid_spec=pltpu.PrefetchScalarGridSpec(
            num_scalar_prefetch=0,
            grid=grid,
            in_specs=[pl.BlockSpec((tr, C), lambda i: (i, 0))],
            out_specs=pl.BlockSpec((tr, C), lambda i: (i, 0)),
        ),
        compiler_params=pltpu.CompilerParams(
            dimension_semantics=("parallel",),
        ),
        input_output_aliases={0: 0},
        cost_estimate=cost,
    )(slab)

    return jnp.reshape(out, out_shape)


if __name__ == "__main__":
    key = jax.random.PRNGKey(0)

    # Small NCHW-style input, as the generator would feed it: (2, 4, 16, 16)
    x = jax.random.normal(key, (2, 4, 16, 16), dtype=jnp.float32)

    # 1) Default path: metadata-only reshape, Reshape(2, -1) semantics.
    y = jax.block_until_ready(reshape_pallas(x, 2, -1))
    y_ref = jnp.reshape(x, (2, 1024))
    assert y.shape == (2, 1024) and y.dtype == x.dtype
    assert bool(jnp.array_equal(y, y_ref))

    # 2) Forced-copy path: runs the Pallas copy kernel (single lane-dense block).
    y2 = jax.block_until_ready(reshape_pallas(x, 2, -1, force_copy=True))
    assert bool(jnp.array_equal(y2, y_ref))

    # 3) Forced-copy with a multi-dim target view: (4, 2, 16, 16).
    z = jax.block_until_ready(reshape_pallas(x, 4, 2, 16, 16, force_copy=True))
    assert bool(jnp.array_equal(z, jnp.reshape(x, (4, 2, 16, 16))))

    # 4) Slightly larger input to exercise the multi-block (tiled) grid path:
    #    (4, 4, 256, 256) f32 -> slab (128, 8192), 2 MiB blocks, grid of 2.
    xb = jax.random.normal(jax.random.PRNGKey(1), (4, 4, 256, 256),
                           dtype=jnp.float32)
    zb = jax.block_until_ready(reshape_pallas(xb, 4, -1, force_copy=True))
    assert zb.shape == (4, 4 * 256 * 256)
    assert bool(jnp.array_equal(zb, jnp.reshape(xb, (4, -1))))

    print("KERNEL_OK")
</pallas_src>

<mosaic_0001>
module attributes {stable_mosaic.version = 11 : i64} {
  func.func @_copy_kernel(%arg0: i32, %arg1: memref<1x2048xf32, #tpu.memory_space<vmem>>, %arg2: memref<1x2048xf32, #tpu.memory_space<vmem>>) attributes {dimension_semantics = [#tpu.dimension_semantics<parallel>], iteration_bounds = array<i64: 1>, scalar_prefetch = 0 : i64, scratch_operands = 0 : i64, tpu.core_type = #tpu.core_type<tc>, window_params = [{transform_indices = @transform_0, window_bounds = array<i64: 1, 2048>}, {transform_indices = @transform_1, window_bounds = array<i64: 1, 2048>}]} {
    %c0 = arith.constant 0 : index
    %c0_0 = arith.constant 0 : index
    %0 = vector.load %arg1[%c0, %c0_0] : memref<1x2048xf32, #tpu.memory_space<vmem>>, vector<1x2048xf32>
    %c0_1 = arith.constant 0 : index
    %c0_2 = arith.constant 0 : index
    %1 = vector.load %arg2[%c0_1, %c0_2] : memref<1x2048xf32, #tpu.memory_space<vmem>>, vector<1x2048xf32>
    tpu.vector_store %arg2[%c0_1, %c0_2], %0 {strides = array<i32>} : memref<1x2048xf32, #tpu.memory_space<vmem>>, vector<1x2048xf32>,
    return
  }
  func.func @transform_0(%arg0: i32) -> (i32, i32) {
    %c0_i32 = arith.constant 0 : i32
    %c0_i32_0 = arith.constant 0 : i32
    return %arg0, %c0_i32 : i32, i32
  }
  func.func @transform_1(%arg0: i32) -> (i32, i32) {
    %c0_i32 = arith.constant 0 : i32
    %c0_i32_0 = arith.constant 0 : i32
    return %arg0, %c0_i32 : i32, i32
  }
}

</mosaic_0001>

<bundles_post_ra>
// kernel: tpu_custom_call.1
= control target key start
LH: loop header
LB: loop body
LE: loop exit
PB: predicated region body
PF: predicated region fallthrough
CT: control target
= control target key end

     0   :  { %6 = vsyncpa [#allocation3], 0  ;;  %s126_s0 = inlined_call_operand.hbm [shape: f32[1,2048], index: 0, kind: input, shape index: {}, may-alias: {0,1}]   ;;  %s127_s1 = inlined_call_operand.hbm [shape: f32[1,2048], index: 1, kind: output, shape index: {}, may-alias: {0,1}]  }
   0x1   :  { %7 = vsyncpa [#allocation4], 0  ;;  %s90_s6 = smov [#allocation2]   ;;  %s42_s10 = scalar_lea.hbm %s126_s0, 256 }
   0x2   :  { %s14_s7 = sshll.u32 %s90_s6, 4  ;;  %p43_p0 = scmp.ne.s32.totalorder %s126_s0, %s42_s10  ;;  %s15_s7 = int_to_ptr.vmem [resolvable:$true] %s14_s7 }
   0x3   :  { %p46_p1 = scmp.lt.u32.totalorder %s42_s10, %s126_s0 }
   0x5   :  { %p48_p2 = pnand %p46_p1, %p43_p0 }
   0x7   :  { %51 = shalt.err (!%p48_p2)
}
   0x8   :  { %s52_s15 = scalar_lea.vmem %s15_s7, 256  ;;  %p57_p4 = scmp.lt.s32.totalorder %s15_s7, %s15_s7 }
   0x9   :  { %p53_p3 = scmp.ne.s32.totalorder %s15_s7, %s52_s15  ;;  %p58_p5 = scmp.lt.s32.totalorder %s52_s15, %s52_s15 }
   0xb   :  { %p59_p6 = por %p58_p5, %p57_p4 }
   0xd   :  { %p60_p7 = pnand %p59_p6, %p53_p3 }
   0xf   :  { %63 = shalt.err (!%p60_p7)
}
  0x10   :  { %17 = dma.hbm_to_vmem [thread:$0]  %s126_s0, 256, %s15_s7, [#allocation3]  }
  0x11   :  { %86 = dma.done.wait [#allocation3], 256  }
  0x12   :  { %87 = vsyncadd [#allocation3], 4294967040  ;;  %s91_s18 = smov [#allocation5]   ;;  %v21_v0 = vld [vmem:[#allocation2] sm:$0xff]  ;;  %v22_v1 = vld [vmem:[#allocation2 + $0x8] sm:$0xff] }
  0x13   :  { %s31_s19 = sshll.u32 %s91_s18, 4  ;;  %23 = vst [vmem:[#allocation5] sm:$0xff] %v21_v0  ;;  %24 = vst [vmem:[#allocation5 + $0x8] sm:$0xff] %v22_v1  ;;  %s32_s19 = int_to_ptr.vmem [resolvable:$true] %s31_s19 }
  0x14   :  { %s64_s20 = scalar_lea.vmem %s32_s19, 256  ;;  %p69_p9 = scmp.lt.s32.totalorder %s32_s19, %s32_s19 }
  0x15   :  { %p65_p8 = scmp.ne.s32.totalorder %s32_s19, %s64_s20  ;;  %p70_p10 = scmp.lt.s32.totalorder %s64_s20, %s64_s20 }
  0x17   :  { %p71_p11 = por %p70_p10, %p69_p9 }
  0x19   :  { %p72_p12 = pnand %p71_p11, %p65_p8 }
  0x1b   :  { %75 = shalt.err (!%p72_p12)
}
  0x1c   :  { %s76_s0 = scalar_lea.hbm %s127_s1, 256 }
  0x1d   :  { %p77_p13 = scmp.ne.s32.totalorder %s127_s1, %s76_s0  ;;  %p80_p0 = scmp.lt.u32.totalorder %s76_s0, %s127_s1 }
  0x1f   :  { %p82_p1 = pnand %p80_p0, %p77_p13 }
  0x21   :  { %85 = shalt.err (!%p82_p1)
}
  0x22   :  { %34 = dma.vmem_to_hbm [thread:$0]  %s32_s19, 256, %s127_s1, [#allocation4]  }
  0x23   :  { %88 = dma.done.wait [#allocation4], 256  }
  0x24   :  { %89 = vsyncadd [#allocation4], 4294967040 }
  0x25   :  { %38 = vsyncpa [#allocation3], 1 }
  0x26   :  { %39 = vsyncpa [#allocation4], 1 }

</bundles_post_ra>
